<compile_context>
chip_gen: v5e
topology: v5e:2x2
jax: 0.10.0
libtpu: 0.0.40
codegen_flags: <defaults>
</compile_context>

<pallas_src>
import jax
import jax.numpy as jnp
from jax import lax
from jax.experimental import pallas as pl
from jax.experimental.pallas import tpu as pltpu

_HIDDEN = 256
_LANE = 128
_A_SUB = 8          # action rows padded to one sublane tile


def _round_up(n, m):
    return ((n + m - 1) // m) * m


def _make_actor_kernel(max_action, state_dim, use_vpu_layer1):
    def kernel(x_ref, w1_ref, b1_ref, w2_ref, b2_ref, w3t_ref, b3t_ref, o_ref):
        tb = x_ref.shape[0]
        hidden = w1_ref.shape[1]

        # ---- Layer 1: (TB, S) @ (S, 256) + b1 -> ReLU -------------------
        # x arrives as f32; round it through bf16 here (keeps the wrapper a
        # single launch and matches the bf16-in / f32-accumulate recipe).
        if use_vpu_layer1:
            # K is tiny (e.g. 3): K broadcast-FMAs on the VPU, in f32
            # (v5e's VPU has no bf16 arithmetic, so keep the math f32 here).
            x = x_ref[...].astype(jnp.bfloat16).astype(jnp.float32)   # (TB, S)
            w1 = w1_ref[...].astype(jnp.float32)                      # (S, 256)
            h1 = jnp.broadcast_to(b1_ref[...], (tb, hidden))
            for k in range(state_dim):                                # static unroll
                h1 = h1 + x[:, k:k + 1] * w1[k:k + 1, :]
        else:
            h1 = jnp.dot(x_ref[...].astype(jnp.bfloat16), w1_ref[...],
                         preferred_element_type=jnp.float32)
            h1 = h1 + b1_ref[...]
        h1 = jnp.maximum(h1, 0.0)

        # ---- Layer 2: (TB, 256) @ (256, 256) + b2 -> ReLU ---------------
        h2 = jnp.dot(h1.astype(jnp.bfloat16), w2_ref[...],
                     preferred_element_type=jnp.float32)
        h2 = jnp.maximum(h2 + b2_ref[...], 0.0)

        # ---- Layer 3 (transposed output): (A8, 256) . (TB, 256)^T -------
        # MXU-native A @ B^T (flash-attention style dimension numbers).
        # The (A8=8, TB) batch-on-lanes slab means tanh + writeback only touch
        # the useful (padded) action rows, not 128 padded lanes.
        h3t = lax.dot_general(
            w3t_ref[...], h2.astype(jnp.bfloat16),
            dimension_numbers=(((1,), (1,)), ((), ())),
            preferred_element_type=jnp.float32)            # (A8, TB)
        h3t = h3t + b3t_ref[...]                           # (A8, 1) lane-broadcast
        o_ref[...] = (max_action * jnp.tanh(h3t)).astype(o_ref.dtype)

    return kernel


def _choose_batch_tile(B, batch_tile):
    """Batch tile choice.

    Per-grid-step overhead (~0.35 us) dwarfs the per-tile MXU work, so use big
    tiles; but keep >= 2 grid steps for large batches so the "parallel" batch
    axis can shard across both TensorCores on v7x.
    """
    if B <= 256:
        return _round_up(max(B, 8), 8)                      # single small tile
    n_tiles = max(2, pl.cdiv(B, batch_tile))
    return min(batch_tile, _round_up(pl.cdiv(B, n_tiles), _LANE))


def actor_forward(x, params, max_action, *, batch_tile=512):
    """Fused 3-layer SAC-actor MLP forward (Pallas, batch-gridded)."""
    w1, b1, w2, b2, w3, b3 = params          # weights stored as (in, out)
    B, S = x.shape
    H = w1.shape[1]
    A = w3.shape[1]

    # Layer-3 weight/bias: transposed and padded to one sublane tile (8 rows).
    w3t = jnp.zeros((_A_SUB, H), w3.dtype).at[:A, :].set(w3.T)
    b3t = jnp.zeros((_A_SUB, 1), b3.dtype).at[:A, 0].set(b3[0])

    TB = _choose_batch_tile(B, batch_tile)
    B_pad = _round_up(B, TB)
    if B_pad != B:
        x = jnp.zeros((B_pad, S), x.dtype).at[:B, :].set(x)

    # bf16 weights into the MXU; x stays f32 (cast inside the kernel); biases f32.
    w1b = w1.astype(jnp.bfloat16)
    w2b = w2.astype(jnp.bfloat16)
    w3tb = w3t.astype(jnp.bfloat16)
    b1f = b1.astype(jnp.float32)
    b2f = b2.astype(jnp.float32)
    b3tf = b3t.astype(jnp.float32)

    grid = (B_pad // TB,)

    def const(shape):
        # Constant block index: the block never changes across grid steps, so
        # it is DMA'd once and stays resident in VMEM for the whole call.
        # TODO(synk): pin to single-buffering (pipeline_mode=pl.Buffered(1))
        # once confirmed supported; double-buffering here only wastes ~0.25 MiB.
        return pl.BlockSpec(shape, lambda i: (0,) * len(shape))

    flops = 2 * B_pad * (S * H + H * H + H * _A_SUB)
    bytes_accessed = (
        x.size * 4 + w1b.size * 2 + w2b.size * 2 + w3tb.size * 2
        + (b1f.size + b2f.size + b3tf.size) * 4
        + _A_SUB * B_pad * 4
    )

    # TODO(synk): for the tiny-batch serving path (grid=1) the call is bound by
    # the ~0.45 MiB weight DMA + launch latency; a cross-call weight-prefetch
    # (P10) would hide it behind the preceding RL-step ops.
    out = pl.pallas_call(
        _make_actor_kernel(float(max_action), S, use_vpu_layer1=(S <= 8)),
        out_shape=jax.ShapeDtypeStruct((_A_SUB, B_pad), jnp.float32),
        grid_spec=pltpu.PrefetchScalarGridSpec(
            num_scalar_prefetch=0,
            grid=grid,
            in_specs=[
                pl.BlockSpec((TB, S), lambda i: (i, 0)),   # x: batch-tiled
                const(w1b.shape), const(b1f.shape),        # weights: resident
                const(w2b.shape), const(b2f.shape),
                const(w3tb.shape), const(b3tf.shape),
            ],
            out_specs=pl.BlockSpec((_A_SUB, TB), lambda i: (0, i)),
        ),
        compiler_params=pltpu.CompilerParams(
            # Batch axis is fully independent -> shard across cores on v7x.
            # TODO(synk): if plain PARALLEL does not split across the 2 TCs on
            # v7x, switch to pltpu.CORE_PARALLEL / a core_map leading axis.
            dimension_semantics=(pltpu.PARALLEL,),
        ),
        cost_estimate=pl.CostEstimate(
            flops=flops,
            transcendentals=B_pad * _A_SUB,      # tanh on the narrow slab only
            bytes_accessed=bytes_accessed,
        ),
    )(x, w1b, b1f, w2b, b2f, w3tb, b3tf)

    # (A8, B_pad) batch-on-lanes slab -> (B, A)
    return out[:A, :B].T


def init_params(key, state_dim, action_dim):
    """Deterministic init mimicking nn.Linear default (uniform +-1/sqrt(fan_in)).
    Weights stored transposed: (in_features, out_features)."""
    ks = jax.random.split(key, 6)

    def linear(kw, kb, fan_in, fan_out):
        bound = 1.0 / jnp.sqrt(jnp.float32(fan_in))
        w = jax.random.uniform(kw, (fan_in, fan_out), jnp.float32, -bound, bound)
        b = jax.random.uniform(kb, (1, fan_out), jnp.float32, -bound, bound)
        return w, b

    w1, b1 = linear(ks[0], ks[1], state_dim, _HIDDEN)
    w2, b2 = linear(ks[2], ks[3], _HIDDEN, _HIDDEN)
    w3, b3 = linear(ks[4], ks[5], _HIDDEN, action_dim)
    # TODO(synk): self.log_std is only used by sample_log_prob (not forward),
    # so it is not part of the kernel.
    return (w1, b1, w2, b2, w3, b3)


def reference_forward(x, params, max_action):
    """Mirrors the kernel math: bf16-cast weights/activations, f32 accumulate."""
    w1, b1, w2, b2, w3, b3 = params
    bf = lambda a: a.astype(jnp.bfloat16).astype(jnp.float32)
    h = jnp.maximum(bf(x) @ bf(w1) + b1, 0.0)
    h = jnp.maximum(bf(h) @ bf(w2) + b2, 0.0)
    return max_action * jnp.tanh(bf(h) @ bf(w3) + b3)


if __name__ == "__main__":
    # Pendulum-v1: state_dim=3, action_dim=1, max_action=2.0
    state_dim, action_dim, max_action = 3, 1, 2.0

    key = jax.random.PRNGKey(0)
    k_x, k_p = jax.random.split(key)
    params = init_params(k_p, state_dim, action_dim)

    def check(batch):
        xb = jax.random.normal(jax.random.fold_in(k_x, batch),
                               (batch, state_dim), jnp.float32)
        out = jax.block_until_ready(actor_forward(xb, params, max_action))
        ref = reference_forward(xb, params, max_action)
        assert out.shape == (batch, action_dim), out.shape
        assert jnp.allclose(out, ref, atol=2e-3, rtol=2e-3), (batch, out, ref)

    check(8)       # single small tile (TB=8, grid=1)
    check(300)     # padded to 512, TB=256, 2 grid steps
    check(1000)    # padded to 1024, TB=512, 2 grid steps (big-tile path)
    print("KERNEL_OK")
</pallas_src>

<mosaic_0001>
module attributes {stable_mosaic.version = 11 : i64} {
  func.func @kernel(%arg0: i32, %arg1: memref<8x3xf32, #tpu.memory_space<vmem>>, %arg2: memref<3x256xbf16, #tpu.memory_space<vmem>>, %arg3: memref<1x256xf32, #tpu.memory_space<vmem>>, %arg4: memref<256x256xbf16, #tpu.memory_space<vmem>>, %arg5: memref<1x256xf32, #tpu.memory_space<vmem>>, %arg6: memref<8x256xbf16, #tpu.memory_space<vmem>>, %arg7: memref<8x1xf32, #tpu.memory_space<vmem>>, %arg8: memref<8x8xf32, #tpu.memory_space<vmem>>) attributes {dimension_semantics = [#tpu.dimension_semantics<parallel>], iteration_bounds = array<i64: 1>, scalar_prefetch = 0 : i64, scratch_operands = 0 : i64, tpu.core_type = #tpu.core_type<tc>, window_params = [{transform_indices = @transform_0, window_bounds = array<i64: 8, 3>}, {pipeline_mode = #tpu.pipeline_mode<synchronous>, transform_indices = @transform_1, window_bounds = array<i64: 3, 256>}, {pipeline_mode = #tpu.pipeline_mode<synchronous>, transform_indices = @transform_2, window_bounds = array<i64: 1, 256>}, {pipeline_mode = #tpu.pipeline_mode<synchronous>, transform_indices = @transform_3, window_bounds = array<i64: 256, 256>}, {pipeline_mode = #tpu.pipeline_mode<synchronous>, transform_indices = @transform_4, window_bounds = array<i64: 1, 256>}, {pipeline_mode = #tpu.pipeline_mode<synchronous>, transform_indices = @transform_5, window_bounds = array<i64: 8, 256>}, {pipeline_mode = #tpu.pipeline_mode<synchronous>, transform_indices = @transform_6, window_bounds = array<i64: 8, 1>}, {transform_indices = @transform_7, window_bounds = array<i64: 8, 8>}]} {
    %c0 = arith.constant 0 : index
    %c0_0 = arith.constant 0 : index
    %0 = vector.load %arg1[%c0, %c0_0] : memref<8x3xf32, #tpu.memory_space<vmem>>, vector<8x3xf32>
    %1 = arith.truncf %0 : vector<8x3xf32> to vector<8x3xbf16>
    %2 = arith.extf %1 : vector<8x3xbf16> to vector<8x3xf32>
    %c0_1 = arith.constant 0 : index
    %c0_2 = arith.constant 0 : index
    %3 = vector.load %arg2[%c0_1, %c0_2] : memref<3x256xbf16, #tpu.memory_space<vmem>>, vector<3x256xbf16>
    %4 = arith.extf %3 : vector<3x256xbf16> to vector<3x256xf32>
    %c0_3 = arith.constant 0 : index
    %c0_4 = arith.constant 0 : index
    %5 = vector.load %arg3[%c0_3, %c0_4] : memref<1x256xf32, #tpu.memory_space<vmem>>, vector<1x256xf32>
    %6 = vector.shape_cast %5 : vector<1x256xf32> to vector<1x256xf32>
    %7 = vector.broadcast %6 : vector<1x256xf32> to vector<8x256xf32>
    %8 = vector.extract_strided_slice %2 {offsets = [0, 0], sizes = [8, 1], strides = [1, 1]} : vector<8x3xf32> to vector<8x1xf32>
    %9 = vector.extract_strided_slice %4 {offsets = [0, 0], sizes = [1, 256], strides = [1, 1]} : vector<3x256xf32> to vector<1x256xf32>
    %10 = vector.broadcast %8 : vector<8x1xf32> to vector<8x256xf32>
    %11 = vector.broadcast %9 : vector<1x256xf32> to vector<8x256xf32>
    %12 = arith.mulf %10, %11 : vector<8x256xf32>
    %13 = arith.addf %7, %12 : vector<8x256xf32>
    %14 = vector.extract_strided_slice %2 {offsets = [0, 1], sizes = [8, 1], strides = [1, 1]} : vector<8x3xf32> to vector<8x1xf32>
    %15 = vector.extract_strided_slice %4 {offsets = [1, 0], sizes = [1, 256], strides = [1, 1]} : vector<3x256xf32> to vector<1x256xf32>
    %16 = vector.broadcast %14 : vector<8x1xf32> to vector<8x256xf32>
    %17 = vector.broadcast %15 : vector<1x256xf32> to vector<8x256xf32>
    %18 = arith.mulf %16, %17 : vector<8x256xf32>
    %19 = arith.addf %13, %18 : vector<8x256xf32>
    %20 = vector.extract_strided_slice %2 {offsets = [0, 2], sizes = [8, 1], strides = [1, 1]} : vector<8x3xf32> to vector<8x1xf32>
    %21 = vector.extract_strided_slice %4 {offsets = [2, 0], sizes = [1, 256], strides = [1, 1]} : vector<3x256xf32> to vector<1x256xf32>
    %22 = vector.broadcast %20 : vector<8x1xf32> to vector<8x256xf32>
    %23 = vector.broadcast %21 : vector<1x256xf32> to vector<8x256xf32>
    %24 = arith.mulf %22, %23 : vector<8x256xf32>
    %25 = arith.addf %19, %24 : vector<8x256xf32>
    %cst = arith.constant 0.000000e+00 : f32
    %26 = vector.broadcast %cst : f32 to vector<8x256xf32>
    %27 = arith.maximumf %25, %26 : vector<8x256xf32>
    %28 = arith.truncf %27 : vector<8x256xf32> to vector<8x256xbf16>
    %c0_5 = arith.constant 0 : index
    %c0_6 = arith.constant 0 : index
    %29 = vector.load %arg4[%c0_5, %c0_6] : memref<256x256xbf16, #tpu.memory_space<vmem>>, vector<256x256xbf16>
    %cst_7 = arith.constant dense<0.000000e+00> : vector<8x256xf32>
    %30 = tpu.matmul %28, %29, %cst_7 {dimension_numbers = #tpu.dot_dimension_numbers<[1], [0], [0], [1], [0, 0, 1, 1], [], []>} : vector<8x256xbf16>, vector<256x256xbf16>, vector<8x256xf32> -> vector<8x256xf32>
    %c0_8 = arith.constant 0 : index
    %c0_9 = arith.constant 0 : index
    %31 = vector.load %arg5[%c0_8, %c0_9] : memref<1x256xf32, #tpu.memory_space<vmem>>, vector<1x256xf32>
    %32 = vector.broadcast %31 : vector<1x256xf32> to vector<8x256xf32>
    %33 = arith.addf %30, %32 : vector<8x256xf32>
    %cst_10 = arith.constant 0.000000e+00 : f32
    %34 = vector.broadcast %cst_10 : f32 to vector<8x256xf32>
    %35 = arith.maximumf %33, %34 : vector<8x256xf32>
    %c0_11 = arith.constant 0 : index
    %c0_12 = arith.constant 0 : index
    %36 = vector.load %arg6[%c0_11, %c0_12] : memref<8x256xbf16, #tpu.memory_space<vmem>>, vector<8x256xbf16>
    %37 = arith.truncf %35 : vector<8x256xf32> to vector<8x256xbf16>
    %cst_13 = arith.constant dense<0.000000e+00> : vector<8x8xf32>
    %38 = tpu.matmul %36, %37, %cst_13 {dimension_numbers = #tpu.dot_dimension_numbers<[1], [1], [0], [0], [0, 0, 1, 0], [], []>} : vector<8x256xbf16>, vector<8x256xbf16>, vector<8x8xf32> -> vector<8x8xf32>
    %c0_14 = arith.constant 0 : index
    %c0_15 = arith.constant 0 : index
    %39 = vector.load %arg7[%c0_14, %c0_15] : memref<8x1xf32, #tpu.memory_space<vmem>>, vector<8x1xf32>
    %40 = vector.broadcast %39 : vector<8x1xf32> to vector<8x8xf32>
    %41 = arith.addf %38, %40 : vector<8x8xf32>
    %42 = math.tanh %41 : vector<8x8xf32>
    %cst_16 = arith.constant 2.000000e+00 : f32
    %43 = vector.broadcast %cst_16 : f32 to vector<8x8xf32>
    %44 = arith.mulf %43, %42 : vector<8x8xf32>
    %c0_17 = arith.constant 0 : index
    %c0_18 = arith.constant 0 : index
    %45 = vector.load %arg8[%c0_17, %c0_18] : memref<8x8xf32, #tpu.memory_space<vmem>>, vector<8x8xf32>
    tpu.vector_store %arg8[%c0_17, %c0_18], %44 {strides = array<i32>} : memref<8x8xf32, #tpu.memory_space<vmem>>, vector<8x8xf32>,
    return
  }
  func.func @transform_0(%arg0: i32) -> (i32, i32) {
    %c0_i32 = arith.constant 0 : i32
    %c0_i32_0 = arith.constant 0 : i32
    return %arg0, %c0_i32 : i32, i32
  }
  func.func @transform_1(%arg0: i32) -> (i32, i32) {
    %c0_i32 = arith.constant 0 : i32
    %c0_i32_0 = arith.constant 0 : i32
    %c0_i32_1 = arith.constant 0 : i32
    return %c0_i32, %c0_i32_0 : i32, i32
  }
  func.func @transform_2(%arg0: i32) -> (i32, i32) {
    %c0_i32 = arith.constant 0 : i32
    %c0_i32_0 = arith.constant 0 : i32
    %c0_i32_1 = arith.constant 0 : i32
    return %c0_i32, %c0_i32_0 : i32, i32
  }
  func.func @transform_3(%arg0: i32) -> (i32, i32) {
    %c0_i32 = arith.constant 0 : i32
    %c0_i32_0 = arith.constant 0 : i32
    %c0_i32_1 = arith.constant 0 : i32
    return %c0_i32, %c0_i32_0 : i32, i32
  }
  func.func @transform_4(%arg0: i32) -> (i32, i32) {
    %c0_i32 = arith.constant 0 : i32
    %c0_i32_0 = arith.constant 0 : i32
    %c0_i32_1 = arith.constant 0 : i32
    return %c0_i32, %c0_i32_0 : i32, i32
  }
  func.func @transform_5(%arg0: i32) -> (i32, i32) {
    %c0_i32 = arith.constant 0 : i32
    %c0_i32_0 = arith.constant 0 : i32
    %c0_i32_1 = arith.constant 0 : i32
    return %c0_i32, %c0_i32_0 : i32, i32
  }
  func.func @transform_6(%arg0: i32) -> (i32, i32) {
    %c0_i32 = arith.constant 0 : i32
    %c0_i32_0 = arith.constant 0 : i32
    %c0_i32_1 = arith.constant 0 : i32
    return %c0_i32, %c0_i32_0 : i32, i32
  }
  func.func @transform_7(%arg0: i32) -> (i32, i32) {
    %c0_i32 = arith.constant 0 : i32
    %c0_i32_0 = arith.constant 0 : i32
    return %c0_i32, %arg0 : i32, i32
  }
}

</mosaic_0001>

<bundles_post_ra>
// kernel: tpu_custom_call.1
= control target key start
LH: loop header
LB: loop body
LE: loop exit
PB: predicated region body
PF: predicated region fallthrough
CT: control target
= control target key end

     0   :  { %12 = vsyncpa [#allocation3], 0  ;;  %s715_s0 = inlined_call_operand.vmem [shape: f32[8,3], index: 0, kind: input, shape index: {}]   ;;  %s716_s1 = inlined_call_operand.vmem [shape: bf16[3,256], index: 1, kind: input, shape index: {}]   ;;  %s717_s2 = inlined_call_operand.vmem [shape: f32[1,256], index: 2, kind: input, shape index: {}]   ;;  %s718_s3 = inlined_call_operand.hbm [shape: bf16[256,256], index: 3, kind: input, shape index: {}]   ;;  %s719_s4 = inlined_call_operand.vmem [shape: f32[1,256], index: 4, kind: input, shape index: {}]   ;;  %s720_s5 = inlined_call_operand.vmem [shape: bf16[8,256], index: 5, kind: input, shape index: {}]   ;;  %s721_s6 = inlined_call_operand.vmem [shape: f32[8,1], index: 6, kind: input, shape index: {}]   ;;  %s722_s7 = inlined_call_operand.hbm [shape: f32[8,8], index: 7, kind: output, shape index: {}]  }
   0x1   :  { %13 = vsyncpa [#allocation4], 0  ;;  %s24_s26 = sshll.u32 %s718_s3, 4  ;;  %s644_s27 = smov [#allocation2]   ;;  %s25_s26 = int_to_ptr.hbm [resolvable:$true] %s24_s26 }
   0x2   :  { %s26_s28 = sshll.u32 %s644_s27, 4  ;;  %s645_s29 = smov 128   ;;  %s27_s28 = int_to_ptr.vmem [resolvable:$true] %s26_s28 }
   0x3   :  { %s646_s30 = smov 8  }
   0x4   :  { %32 = dma.hbm_to_vmem [thread:$0]  %s25_s26, 4096, %s27_s28, [#allocation3], %s645_s29, %s645_s29, %s646_s30  }
   0x5   :  { %640 = dma.done.wait [#allocation3], 4096  }
   0x6   :  { %641 = vsyncadd [#allocation3], 4294963200  ;;  %v647_v0 = vmov 0   ;;  %v648_v1 = vmov 2   ;;  %v44_v2 = vld [vmem:[%s715_s0] sm:$0xff]  ;;  %v649_v41 = vmov 1  }
   0x7   :  { %585 = vset.pattern.permute.xlu0 %v647_v0  ;;  %587 = vset.pattern.permute.xlu1 %v648_v1  ;;  %v476_v3 = vld [vmem:[#allocation2 + $0x70] sm:$0xf]  ;;  %v561_v4 = vld [vmem:[#allocation2 + $0x74] sm:$0xf0]  ;;  %v45_v5 = vpack.c.bf16 %v44_v2, %v44_v2  ;;  %v560_v9 = vld [vmem:[#allocation2 + $0x74] sm:$0xf] }
   0x8   :  { %v477_v6 = vor.u32 %v561_v4, %v476_v3  ;;  %v540_v7 = vld [vmem:[#allocation2 + $0xf0] sm:$0xf]  ;;  %v577_v8 = vld [vmem:[#allocation2 + $0xf4] sm:$0xf0]  ;;  %v478_v11 = vld [vmem:[#allocation2 + $0x78] sm:$0xf0] }
   0x9   :  { %v541_v10 = vor.u32 %v577_v8, %v540_v7  ;;  %v576_v12 = vld [vmem:[#allocation2 + $0xf4] sm:$0xf]  ;;  %v542_v13 = vld [vmem:[#allocation2 + $0xf8] sm:$0xf0]  ;;  %v46_v14 = vunpack.c.l.bf16 %v45_v5  ;;  %v481_v15 = vor.u32 %v560_v9, %v478_v11  ;;  %v468_v17 = vld [vmem:[#allocation2 + $0x60] sm:$0xf] }
   0xa   :  { %301 = vmatpush.bf16.msra.mxu0 %v477_v6  ;;  %v545_v16 = vor.u32 %v576_v12, %v542_v13  ;;  %v559_v18 = vld [vmem:[#allocation2 + $0x64] sm:$0xf0]  ;;  %v532_v19 = vld [vmem:[#allocation2 + $0xe0] sm:$0xf]  ;;  %v558_v22 = vld [vmem:[#allocation2 + $0x64] sm:$0xf] }
   0xb   :  { %314 = vmatpush.bf16.msra.mxu1 %v541_v10  ;;  %v469_v20 = vor.u32 %v559_v18, %v468_v17  ;;  %v575_v21 = vld [vmem:[#allocation2 + $0xe4] sm:$0xf0]  ;;  %v470_v23 = vld [vmem:[#allocation2 + $0x68] sm:$0xf0]  ;;  %57 = vperm.xlu0 %585, %v46_v14   ;;  %v574_v25 = vld [vmem:[#allocation2 + $0xe4] sm:$0xf] }
   0xc   :  { %86 = vperm.xlu1 %587, %v46_v14   ;;  %v533_v24 = vor.u32 %v575_v21, %v532_v19  ;;  %v534_v26 = vld [vmem:[#allocation2 + $0xe8] sm:$0xf0]  ;;  %v460_v27 = vld [vmem:[#allocation2 + $0x50] sm:$0xf]  ;;  %327 = vmatpush.bf16.msra.mxu2 %v481_v15  ;;  %v473_v28 = vor.u32 %v558_v22, %v470_v23  ;;  %v557_v30 = vld [vmem:[#allocation2 + $0x54] sm:$0xf0] }
   0xd   :  { %340 = vmatpush.bf16.msra.mxu3 %v545_v16  ;;  %v537_v29 = vor.u32 %v574_v25, %v534_v26  ;;  %v524_v31 = vld [vmem:[#allocation2 + $0xd0] sm:$0xf]  ;;  %v573_v32 = vld [vmem:[#allocation2 + $0xd4] sm:$0xf0]  ;;  %v461_v33 = vor.u32 %v557_v30, %v460_v27  ;;  %v556_v34 = vld [vmem:[#allocation2 + $0x54] sm:$0xf] }
   0xe   :  { %302 = vmatpush.bf16.msra.mxu0 %v469_v20  ;;  %v462_v35 = vld [vmem:[#allocation2 + $0x58] sm:$0xf0]  ;;  %v525_v36 = vor.u32 %v573_v32, %v524_v31  ;;  %v572_v37 = vld [vmem:[#allocation2 + $0xd4] sm:$0xf]  ;;  %v452_v42 = vld [vmem:[#allocation2 + $0x40] sm:$0xf] }
   0xf   :  { %315 = vmatpush.bf16.msra.mxu1 %v533_v24  ;;  %v526_v38 = vld [vmem:[#allocation2 + $0xd8] sm:$0xf0]  ;;  %v465_v39 = vor.u32 %v556_v34, %v462_v35  ;;  %v555_v43 = vld [vmem:[#allocation2 + $0x44] sm:$0xf0]  ;;  %v516_v44 = vld [vmem:[#allocation2 + $0xc0] sm:$0xf] }
  0x10   :  { %328 = vmatpush.bf16.msra.mxu2 %v473_v28  ;;  %v529_v40 = vor.u32 %v572_v37, %v526_v38  ;;  %v453_v45 = vor.u32 %v555_v43, %v452_v42  ;;  %v571_v46 = vld [vmem:[#allocation2 + $0xc4] sm:$0xf0]  ;;  %v554_v47 = vld [vmem:[#allocation2 + $0x44] sm:$0xf]  ;;  %v454_v48 = vld [vmem:[#allocation2 + $0x48] sm:$0xf0] }
  0x11   :  { %341 = vmatpush.bf16.msra.mxu3 %v537_v29  ;;  %v517_v49 = vor.u32 %v571_v46, %v516_v44  ;;  %v457_v50 = vor.u32 %v554_v47, %v454_v48  ;;  %v570_v51 = vld [vmem:[#allocation2 + $0xc4] sm:$0xf]  ;;  %v518_v52 = vld [vmem:[#allocation2 + $0xc8] sm:$0xf0]  ;;  %v444_v54 = vld [vmem:[#allocation2 + $0x30] sm:$0xf] }
  0x12   :  { %303 = vmatpush.bf16.msra.mxu0 %v461_v33  ;;  %v521_v53 = vor.u32 %v570_v51, %v518_v52  ;;  %v553_v55 = vld [vmem:[#allocation2 + $0x34] sm:$0xf0]  ;;  %v508_v56 = vld [vmem:[#allocation2 + $0xb0] sm:$0xf]  ;;  %v552_v59 = vld [vmem:[#allocation2 + $0x34] sm:$0xf] }
  0x13   :  { %316 = vmatpush.bf16.msra.mxu1 %v525_v36  ;;  %586 = vset.pattern.permute.xlu0 %v649_v41  ;;  %v445_v57 = vor.u32 %v553_v55, %v444_v54  ;;  %v569_v58 = vld [vmem:[#allocation2 + $0xb4] sm:$0xf0]  ;;  %v446_v60 = vld [vmem:[#allocation2 + $0x38] sm:$0xf0]  ;;  %v568_v63 = vld [vmem:[#allocation2 + $0xb4] sm:$0xf] }
  0x14   :  { %588 = vset.pattern.permute.xlu1 %v647_v0  ;;  %72 = vperm.xlu0 %586, %v46_v14   ;;  %v509_v61 = vor.u32 %v569_v58, %v508_v56  ;;  %v449_v62 = vor.u32 %v552_v59, %v446_v60  ;;  %v436_v1 = vld [vmem:[#allocation2 + $0x20] sm:$0xf]  ;;  %v551_v3 = vld [vmem:[#allocation2 + $0x24] sm:$0xf0]  ;;  %v550_v8 = vld [vmem:[#allocation2 + $0x24] sm:$0xf] }
  0x15   :  { %329 = vmatpush.bf16.msra.mxu2 %v465_v39  ;;  %342 = vmatpush.bf16.msra.mxu3 %v529_v40  ;;  %v500_v4 = vld [vmem:[#allocation2 + $0xa0] sm:$0xf]  ;;  %v567_v5 = vld [vmem:[#allocation2 + $0xa4] sm:$0xf0]  ;;  %v437_v6 = vor.u32 %v551_v3, %v436_v1  ;;  %v438_v9 = vld [vmem:[#allocation2 + $0x28] sm:$0xf0] }
  0x16   :  { %304 = vmatpush.bf16.msra.mxu0 %v453_v45  ;;  %v501_v7 = vor.u32 %v567_v5, %v500_v4  ;;  %v566_v10 = vld [vmem:[#allocation2 + $0xa4] sm:$0xf]  ;;  %v441_v11 = vor.u32 %v550_v8, %v438_v9  ;;  %v502_v12 = vld [vmem:[#allocation2 + $0xa8] sm:$0xf0]  ;;  %v428_v14 = vld [vmem:[#allocation2 + $0x10] sm:$0xf] }
  0x17   :  { %317 = vmatpush.bf16.msra.mxu1 %v517_v49  ;;  %v505_v13 = vor.u32 %v566_v10, %v502_v12  ;;  %v549_v15 = vld [vmem:[#allocation2 + $0x14] sm:$0xf0]  ;;  %v492_v17 = vld [vmem:[#allocation2 + $0x90] sm:$0xf]  ;;  %v548_v19 = vld [vmem:[#allocation2 + $0x14] sm:$0xf] }
  0x18   :  { %v429_v16 = vor.u32 %v549_v15, %v428_v14  ;;  %v565_v18 = vld [vmem:[#allocation2 + $0x94] sm:$0xf0]  ;;  %v430_v21 = vld [vmem:[#allocation2 + $0x18] sm:$0xf0]  ;;  %v564_v22 = vld [vmem:[#allocation2 + $0x94] sm:$0xf] }
  0x19   :  { %330 = vmatpush.bf16.msra.mxu2 %v457_v50  ;;  %343 = vmatpush.bf16.msra.mxu3 %v521_v53  ;;  %v493_v20 = vor.u32 %v565_v18, %v492_v17  ;;  %v494_v23 = vld [vmem:[#allocation2 + $0x98] sm:$0xf0]  ;;  %v433_v24 = vor.u32 %v548_v19, %v430_v21  ;;  %v420_v26 = vld [vmem:[#allocation2] sm:$0xf]  ;;  %v547_v27 = vld [vmem:[#allocation2 + $0x4] sm:$0xf0] }
  0x1a   :  { %305 = vmatpush.bf16.msra.mxu0 %v445_v57  ;;  %v497_v25 = vor.u32 %v564_v22, %v494_v23  ;;  %v484_v28 = vld [vmem:[#allocation2 + $0x80] sm:$0xf]  ;;  %v421_v29 = vor.u32 %v547_v27, %v420_v26  ;;  %v563_v30 = vld [vmem:[#allocation2 + $0x84] sm:$0xf0]  ;;  %v546_v31 = vld [vmem:[#allocation2 + $0x4] sm:$0xf] }
  0x1b   :  { %318 = vmatpush.bf16.msra.mxu1 %v509_v61  ;;  %v422_v32 = vld [vmem:[#allocation2 + $0x8] sm:$0xf0]  ;;  %v485_v33 = vor.u32 %v563_v30, %v484_v28  ;;  %v562_v35 = vld [vmem:[#allocation2 + $0x84] sm:$0xf]  ;;  %v47_v38 = vld [vmem:[%s716_s1] sm:$0xf] }
  0x1c   :  { %589 = vset.pattern.permute.xlu0 %v647_v0  ;;  %v510_v0 = vld [vmem:[#allocation2 + $0xb8] sm:$0xf0]  ;;  %v425_v34 = vor.u32 %v546_v31, %v422_v32  ;;  %v486_v36 = vld [vmem:[#allocation2 + $0x88] sm:$0xf0]  ;;  %v48_v39 = vunpack.c.l.bf16 %v47_v38  ;;  %v49_v45 = vld [vmem:[%s717_s2] sm:$0x3] }
  0x1d   :  { %v513_v2 = vor.u32 %v568_v63, %v510_v0  ;;  %331 = vmatpush.bf16.msra.mxu2 %v449_v62  ;;  %v489_v37 = vor.u32 %v562_v35, %v486_v36  ;;  %v51_v50 = vperm.slane %v49_v45, 0  ;;  %v52_v51 = vperm.slane %v49_v45, 1  ;;  %v358_v10 = vld [vmem:[%s721_s6] sm:$0xff]  ;;  %s408_s17 = sshll.u32 %s722_s7, 4  ;;  %s409_s17 = int_to_ptr.hbm [resolvable:$true] %s408_s17 }
  0x1e   :  { %306 = vmatpush.bf16.msra.mxu0 %v437_v6  ;;  %v61_v40 = vperm.slane %v48_v39, 0  ;;  %v62_v41 = vperm.slane %v48_v39, 4  ;;  %v89_v43 = vperm.slane %v48_v39, 2  ;;  %v90_v44 = vperm.slane %v48_v39, 6  ;;  %361 = vperm.xlu1 %588, %v358_v10   ;;  %v355_v19 = vld [vmem:[%s720_s5] sm:$0xff] }
  0x1f   :  { %344 = vmatpush.bf16.msra.mxu3 %v513_v2  ;;  %319 = vmatpush.bf16.msra.mxu1 %v501_v7  ;;  %v75_v48 = vperm.slane %v48_v39, 1  ;;  %v76_v49 = vperm.slane %v48_v39, 5  ;;  %v365_v26 = vunpack.c.l.b16 %v355_v19  ;;  %vm399_vm0 = vcmask 64512  }
  0x20   :  { %v65_v46 = vperm.slane %v61_v40, 0  ;;  %v66_v47 = vperm.slane %v62_v41, 0  ;;  %v93_v52 = vperm.slane %v89_v43, 2  ;;  %v94_v53 = vperm.slane %v90_v44, 2 }
  0x21   :  { %332 = vmatpush.bf16.msra.mxu2 %v441_v11  ;;  %v79_v56 = vperm.slane %v75_v48, 1  ;;  %v80_v57 = vperm.slane %v76_v49, 1  ;;  %v135_v11 = vld [vmem:[%s719_s4] sm:$0x3]  ;;  %s650_s4 = smov [#allocation5]  }
  0x22   :  { %307 = vmatpush.bf16.msra.mxu0 %v429_v16  ;;  %v137_v12 = vperm.slane %v135_v11, 0  ;;  %v138_v17 = vperm.slane %v135_v11, 1  ;;  %s406_s5 = sshll.u32 %s650_s4, 4  ;;  %s407_s5 = int_to_ptr.vmem [resolvable:$true] %s406_s5 }
  0x23   :  { %345 = vmatpush.bf16.msra.mxu3 %v505_v13  ;;  %320 = vmatpush.bf16.msra.mxu1 %v493_v20 }
  0x25   :  { %333 = vmatpush.bf16.msra.mxu2 %v433_v24 }
  0x26   :  { %308 = vmatpush.bf16.msra.mxu0 %v421_v29  ;;  %v367_v29 = vpack.c.b16 %v365_v26, %v365_v26 }
  0x27   :  { %346 = vmatpush.bf16.msra.mxu3 %v497_v25  ;;  %321 = vmatpush.bf16.msra.mxu1 %v485_v33  ;;  %v366_v33 = vunpack.c.h.b16 %v355_v19 }
  0x29   :  { %334 = vmatpush.bf16.msra.mxu2 %v425_v34  ;;  %v368_v34 = vpack.c.b16 %v366_v33, %v366_v33 }
  0x2b   :  { %347 = vmatpush.bf16.msra.mxu3 %v489_v37 }
  0x7d   :  { %v58_v42 = vpop.permute.xlu0 %57 }
  0x7e   :  { %v67_v54 = vmul.f32 %v65_v46, %v58_v42  ;;  %v68_v55 = vmul.f32 %v66_v47, %v58_v42  ;;  %v87_v58 = vpop.permute.xlu1 %86 }
  0x7f   :  { %v95_v60 = vmul.f32 %v93_v52, %v87_v58  ;;  %v96_v61 = vmul.f32 %v94_v53, %v87_v58 }
  0x80   :  { %v69_v62 = vadd.f32 %v67_v54, %v51_v50  ;;  %v70_v63 = vadd.f32 %v68_v55, %v52_v51 }
  0x86   :  { %v73_v59 = vpop.permute.xlu0 %72 }
  0x87   :  { %v81_v0 = vmul.f32 %v79_v56, %v73_v59  ;;  %v82_v1 = vmul.f32 %v80_v57, %v73_v59 }
  0x89   :  { %v83_v2 = vadd.f32 %v81_v0, %v69_v62  ;;  %v84_v3 = vadd.f32 %v82_v1, %v70_v63 }
  0x8b   :  { %v97_v4 = vadd.f32 %v95_v60, %v83_v2  ;;  %v98_v5 = vadd.f32 %v96_v61, %v84_v3 }
  0x8d   :  { %v99_v6 = vmax.f32 %v97_v4, 0.0  ;;  %v100_v7 = vmax.f32 %v98_v5, 0.0 }
  0x8f   :  { %v101_v8 = vpack.c.bf16 %v99_v6, %v99_v6  ;;  %v102_v9 = vpack.c.bf16 %v100_v7, %v100_v7 }
  0x90   :  { %v362_v36 = vpop.permute.xlu1 %361 }
  0x91   :  { %309 = vmatmul.bf16.vlgmr.msra.gmra.mxu0 %v101_v8  ;;  %322 = vmatmul.bf16.vlgmr.msra.gmra.mxu1 %v102_v9 }
  0x92   :  { %335 = vmatmul.bf16.vlgmr.msra.gmra.mxu2 %v101_v8  ;;  %348 = vmatmul.bf16.vlgmr.msra.gmra.mxu3 %v102_v9 }
 0x10e   :  { %v310_v13 = vpop.f32.mrf.mxu0  ;;  %v323_v14 = vpop.f32.mrf.mxu1 }
 0x10f   :  { %v311_v15 = vadd.f32 %v310_v13, %v137_v12 }
 0x111   :  { %v324_v16 = vadd.f32 %v323_v14, %v311_v15 }
 0x113   :  { %v353_v18 = vmax.f32 %v324_v16, 0.0 }
 0x115   :  { %v336_v20 = vpop.f32.mrf.mxu2  ;;  %v349_v21 = vpop.f32.mrf.mxu3  ;;  %v356_v22 = vpack.c.bf16 %v353_v18, %v353_v18 }
 0x116   :  { %v337_v23 = vadd.f32 %v336_v20, %v138_v17  ;;  %v312_v24 = vpop.f32.mrf.mxu0  ;;  %v325_v25 = vpop.f32.mrf.mxu1 }
 0x117   :  { %378 = vmatpush.bf16.xpose.msrb.mxu0 %v356_v22 }
 0x118   :  { %v350_v27 = vadd.f32 %v349_v21, %v337_v23 }
 0x11a   :  { %v354_v28 = vmax.f32 %v350_v27, 0.0 }
 0x11c   :  { %v357_v30 = vpack.c.bf16 %v354_v28, %v354_v28 }
 0x11d   :  { %v338_v31 = vpop.f32.mrf.mxu2  ;;  %v351_v32 = vpop.f32.mrf.mxu3 }
 0x11e   :  { %391 = vmatpush.bf16.xpose.msrb.mxu1 %v357_v30  ;;  %379 = vmatmul.bf16.vlgmr.msrb.gmra.mxu0 %v367_v29 }
 0x125   :  { %392 = vmatmul.bf16.vlgmr.msrb.gmra.mxu1 %v368_v34 }
 0x19b   :  { %v380_v35 = vpop.f32.mrf.mxu0 }
 0x19c   :  { %v381_v37 = vadd.f32 %v380_v35, %v362_v36 }
 0x1a2   :  { %v393_v38 = vpop.f32.mrf.mxu1 }
 0x1a3   :  { %v394_v39 = vadd.f32 %v393_v38, %v381_v37  ;;  %v382_v40 = vpop.f32.mrf.mxu0 }
 0x1a5   :  { %590 = vtanh.f32 %v394_v39 }
 0x1aa   :  { %v395_v41 = vpop.f32.mrf.mxu1 }
 0x1ab   :  { %v591_v42 = vpop.eup %590 }
 0x1ac   :  { %v398_v43 = vmul.f32 2.0, %v591_v42 }
 0x1ae   :  { %400 = vst.msk [vmem:[#allocation5] sm:$0xff] %vm399_vm0, %v398_v43 }
 0x1af   :  { %411 = dma.vmem_to_hbm [thread:$0]  %s407_s5, 128, %s409_s17, [#allocation4]  }
 0x1b0   :  { %642 = dma.done.wait [#allocation4], 128  }
 0x1b1   :  { %643 = vsyncadd [#allocation4], 4294967168 }
 0x1b2   :  { %416 = vsyncpa [#allocation3], 1 }
 0x1b3   :  { %417 = vsyncpa [#allocation4], 1 }

</bundles_post_ra>
